<compile_context>
chip_gen: v5e
topology: v5e:2x2
jax: 0.10.0
libtpu: 0.0.40
codegen_flags: <defaults>
</compile_context>

<pallas_src>
import functools

import jax
import jax.numpy as jnp
from jax.experimental import pallas as pl
from jax.experimental.pallas import tpu as pltpu


def _silu(v):
    return v * jax.nn.sigmoid(v)


def _round_up(v, m):
    return (v + m - 1) // m * m


# ---------------- Pallas kernel ----------------

def _kan_kernel(ss_ref, x_ref, w_ref, gamma_ref, beta_ref, o_ref, acc_ref, *,
                order, polynomial, seg_w, out_features, out_pad, matmul_dtype):
    SW = seg_w
    x = x_ref[...].astype(jnp.float32)

    # Segment 0: base path SiLU(x) @ base_weight^T. Writing (not +=) initializes
    # the accumulator, so no separate zero-init pass is needed.
    acc_ref[...] = jnp.dot(_silu(x).astype(matmul_dtype), w_ref[0:SW, :],
                           preferred_element_type=jnp.float32)

    # x_n = 2*(x - min)/(max - min + 1e-8) - 1, folded into mul+add
    # (scale/shift precomputed in the wrapper, read from SMEM).
    x_n = x * ss_ref[0] + ss_ref[1]

    # Segment 1: P_0 = 1.
    p_prev = jnp.ones_like(x_n)
    acc_ref[...] += jnp.dot(p_prev.astype(matmul_dtype), w_ref[SW:2 * SW, :],
                            preferred_element_type=jnp.float32)

    if order >= 1:
        p_cur = 2.0 * x_n if polynomial == "Chebyshev_2" else x_n      # P_1
        acc_ref[...] += jnp.dot(p_cur.astype(matmul_dtype), w_ref[2 * SW:3 * SW, :],
                                preferred_element_type=jnp.float32)
        # Rolling two-term recurrence; only prev/cur live, math kept in f32,
        # each P_k narrowed to matmul_dtype only at its dot.
        for n in range(1, order):
            if polynomial == "Legendre":
                p_next = ((2.0 * n + 1.0) * x_n * p_cur
                          - float(n) * p_prev) * (1.0 / (n + 1.0))
            else:
                p_next = 2.0 * x_n * p_cur - p_prev
            p_prev, p_cur = p_cur, p_next
            acc_ref[...] += jnp.dot(p_cur.astype(matmul_dtype),
                                    w_ref[(n + 2) * SW:(n + 3) * SW, :],
                                    preferred_element_type=jnp.float32)

    y = acc_ref[...]

    # TODO(synk): CustomNorm is not defined in the provided source; implemented as a
    # LayerNorm-style per-sample normalization over out_features with gamma/beta.
    # Padded output columns are exactly zero (weights/gamma/beta zero-padded), so
    # sums over OUT_PAD divided by the true out_features give correct moments; the
    # two-pass variance removes the (0 - mu)^2 contribution of the padded columns.
    inv_n = 1.0 / float(out_features)
    mu = jnp.sum(y, axis=-1, keepdims=True) * inv_n
    d = y - mu
    var = (jnp.sum(d * d, axis=-1, keepdims=True)
           - float(out_pad - out_features) * mu * mu) * inv_n
    y = d * jax.lax.rsqrt(var + 1e-5)
    y = y * gamma_ref[...] + beta_ref[...]

    # Dropout is identity in eval mode.
    o_ref[...] = _silu(y).astype(o_ref.dtype)


# ---------------- one-time weight packing (outside the hot path) ----------------

def pack_kan_weights(base_weight, poly_weight, gamma, beta, *, order,
                     matmul_dtype=jnp.bfloat16):
    """Pre-pack weights ONCE. Layout: segment 0 = base_weight^T, segment 1+k =
    poly weights for basis P_k; each segment padded to a multiple of 8 rows
    (sublane-aligned static slicing) and OUT padded to a multiple of 128 lanes."""
    OUT, IN = base_weight.shape
    K1 = order + 1
    assert poly_weight.shape == (OUT, IN * K1)
    SEG = _round_up(IN, 8)
    OUT_PAD = _round_up(OUT, 128)

    wb = jnp.pad(base_weight.T, ((0, SEG - IN), (0, 0)))                   # (SEG, OUT)
    wp = jnp.transpose(poly_weight.reshape(OUT, IN, K1), (2, 1, 0))        # (K1, IN, OUT)
    wp = jnp.pad(wp, ((0, 0), (0, SEG - IN), (0, 0))).reshape(K1 * SEG, OUT)
    w_full = jnp.concatenate([wb, wp], axis=0)                             # ((K1+1)*SEG, OUT)
    # NOTE: padded output columns MUST stay exactly zero -- the in-kernel norm
    # divides sums over OUT_PAD by the true out_features and relies on it.
    w_full = jnp.pad(w_full, ((0, 0), (0, OUT_PAD - OUT))).astype(matmul_dtype)
    gamma2 = jnp.pad(gamma.reshape(1, OUT).astype(jnp.float32),
                     ((0, 0), (0, OUT_PAD - OUT)))
    beta2 = jnp.pad(beta.reshape(1, OUT).astype(jnp.float32),
                    ((0, 0), (0, OUT_PAD - OUT)))
    return w_full, gamma2, beta2


# ---------------- forward from pre-packed weights ----------------

def kan_layer_forward_packed(x, w_full, gamma2, beta2, *, polynomial="Chebyshev_1",
                             order=3, out_features, block_m=512,
                             matmul_dtype=jnp.bfloat16, stream_dtype=None):
    if polynomial not in ("Chebyshev_1", "Chebyshev_2", "Legendre"):
        raise ValueError("Polynomial not implemented")
    B, IN = x.shape
    SEG = w_full.shape[0] // (order + 2)
    OUT_PAD = w_full.shape[1]
    SLAB_W = SEG * (order + 2)
    assert SEG >= IN and w_full.shape[0] == SLAB_W

    stream_dtype = matmul_dtype if stream_dtype is None else stream_dtype
    out_dtype = x.dtype

    # Per-generation VMEM budget: 128 MiB on v5e/v6e, 64 MiB per TC on v7x.
    # Keep explicit headroom for Mosaic internal scratch / semaphores / DMA metadata.
    try:
        phys_vmem = int(pltpu.get_tpu_info().vmem_capacity_bytes)
    except Exception:
        phys_vmem = 64 * 2**20          # conservative (v7x per-TC)
    budget = min(int(phys_vmem * 0.65), 80 * 2**20)

    stream_isz = jnp.dtype(stream_dtype).itemsize
    out_isz = jnp.dtype(out_dtype).itemsize
    w_bytes = SLAB_W * OUT_PAD * jnp.dtype(matmul_dtype).itemsize

    def _vmem_est(bm):
        return (2 * bm * SEG * stream_isz        # x tile (double-buffered)
                + 2 * bm * OUT_PAD * out_isz     # out tile (double-buffered)
                + w_bytes                        # stacked weights (single-buffered)
                + 2 * 2 * OUT_PAD * 4            # gamma / beta
                + bm * OUT_PAD * 4               # f32 accumulator scratch
                + (1 << 20))                     # margin

    # block_m: big tiles amortize per-step overhead (v5e/v6e); multiple of 16 for
    # bf16 sublane packing; keep >=2 tiles for large B so both v7x TCs get work.
    block_m = max(16, min(_round_up(block_m, 16), _round_up(B, 16)))
    if B > 256 and _round_up(B, block_m) // block_m < 2:
        block_m = _round_up((B + 1) // 2, 16)
    while _vmem_est(block_m) > budget and block_m > 16:
        block_m = max(16, _round_up(block_m // 2, 16))
    # TODO(synk): for weights too large to sit resident in VMEM (v7x), add an
    # OUT / segment grid axis streaming weight tiles instead of shrinking block_m.

    B_pad = _round_up(B, block_m)

    # Global min/max as a plain XLA reduction, folded into scale/shift so the
    # kernel does a mul+add instead of a per-element divide.
    x_min = jnp.min(x).astype(jnp.float32)
    x_max = jnp.max(x).astype(jnp.float32)
    inv = 1.0 / (x_max - x_min + 1e-8)
    ss = jnp.stack([2.0 * inv, -2.0 * x_min * inv - 1.0])           # (2,) f32 in SMEM

    # Stream x in the narrow dtype; pad batch / feature dims only when needed.
    x_in = x.astype(stream_dtype) if x.dtype != stream_dtype else x
    if B_pad != B or SEG != IN:
        x_in = jnp.pad(x_in, ((0, B_pad - B), (0, SEG - IN)))

    vmem_limit = int(min(phys_vmem - (8 << 20),
                         max(32 << 20, int(1.25 * _vmem_est(block_m)) + (2 << 20))))

    cost = pl.CostEstimate(
        flops=2 * B_pad * SLAB_W * OUT_PAD + 12 * B_pad * (SEG + OUT_PAD),
        transcendentals=2 * B_pad * (SEG + OUT_PAD),
        bytes_accessed=int(B_pad * SEG * stream_isz + w_bytes
                           + B_pad * OUT_PAD * out_isz + 4 * OUT_PAD * 4),
    )

    kernel = functools.partial(
        _kan_kernel, order=order, polynomial=polynomial, seg_w=SEG,
        out_features=out_features, out_pad=OUT_PAD, matmul_dtype=matmul_dtype)

    grid = (B_pad // block_m,)
    out = pl.pallas_call(
        kernel,
        out_shape=jax.ShapeDtypeStruct((B_pad, OUT_PAD), out_dtype),
        grid=grid,
        in_specs=[
            pl.BlockSpec(memory_space=pltpu.MemorySpace.SMEM),        # scale/shift (2,)
            pl.BlockSpec((block_m, SEG), lambda i: (i, 0)),           # x tile
            # Grid-invariant operands: single-buffered (constant index_map).
            pl.BlockSpec((SLAB_W, OUT_PAD), lambda i: (0, 0),
                         pipeline_mode=pl.Buffered(1)),
            pl.BlockSpec((1, OUT_PAD), lambda i: (0, 0),
                         pipeline_mode=pl.Buffered(1)),
            pl.BlockSpec((1, OUT_PAD), lambda i: (0, 0),
                         pipeline_mode=pl.Buffered(1)),
        ],
        out_specs=pl.BlockSpec((block_m, OUT_PAD), lambda i: (i, 0)),
        scratch_shapes=[pltpu.VMEM((block_m, OUT_PAD), jnp.float32)],
        compiler_params=pltpu.CompilerParams(
            dimension_semantics=("parallel",),
            vmem_limit_bytes=vmem_limit),
        cost_estimate=cost,
    )(ss, x_in, w_full, gamma2, beta2)

    if B_pad == B and OUT_PAD == out_features:
        return out
    return out[:B, :out_features]


# ---------------- convenience wrapper (packs + runs; packing not in hot path) ----

def kan_layer_forward(x, base_weight, poly_weight, gamma, beta, *,
                      polynomial="Chebyshev_1", order=3, block_m=512,
                      matmul_dtype=jnp.bfloat16, stream_dtype=None):
    OUT = base_weight.shape[0]
    packed = pack_kan_weights(base_weight, poly_weight, gamma, beta,
                              order=order, matmul_dtype=matmul_dtype)
    return kan_layer_forward_packed(x, *packed, polynomial=polynomial, order=order,
                                    out_features=OUT, block_m=block_m,
                                    matmul_dtype=matmul_dtype,
                                    stream_dtype=stream_dtype)


# ---------------- pure-JAX reference (mirrors the PyTorch forward) ----------------

def kan_layer_reference(x, base_weight, poly_weight, gamma, beta, *,
                        polynomial="Chebyshev_1", order=3):
    base_out = _silu(x) @ base_weight.T
    x_n = 2.0 * (x - x.min()) / (x.max() - x.min() + 1e-8) - 1.0
    if polynomial == "Chebyshev_2":
        polys = [jnp.ones_like(x_n), 2.0 * x_n]
    else:
        polys = [jnp.ones_like(x_n), x_n]
    for n in range(1, order):
        if polynomial == "Legendre":
            polys.append(((2.0 * n + 1.0) * x_n * polys[-1] - n * polys[-2]) / (n + 1.0))
        else:
            polys.append(2.0 * x_n * polys[-1] - polys[-2])
    basis = jnp.stack(polys[: order + 1], axis=-1).reshape(x.shape[0], -1)
    poly_out = basis @ poly_weight.T
    y = base_out + poly_out
    mu = y.mean(-1, keepdims=True)
    var = ((y - mu) ** 2).mean(-1, keepdims=True)
    y = (y - mu) / jnp.sqrt(var + 1e-5) * gamma + beta
    return _silu(y)


# ---------------- main ----------------

if __name__ == "__main__":
    B, IN, OUT, ORDER = 16, 32, 32, 3
    K1 = ORDER + 1

    key = jax.random.PRNGKey(0)
    kx, kb, kp = jax.random.split(key, 3)

    x = jax.random.normal(kx, (B, IN), dtype=jnp.float32)

    # kaiming_uniform_(nonlinearity='linear'): bound = sqrt(3 / fan_in)
    bb = jnp.sqrt(3.0 / IN)
    base_weight = jax.random.uniform(kb, (OUT, IN), jnp.float32, -bb, bb)
    bp = jnp.sqrt(3.0 / (IN * K1))
    poly_weight = jax.random.uniform(kp, (OUT, IN * K1), jnp.float32, -bp, bp)

    gamma = jnp.ones((OUT,), jnp.float32)
    beta = jnp.zeros((OUT,), jnp.float32)

    # Pre-pack weights once (f32 and bf16 matmul variants) -- outside the hot path.
    packed_f32 = pack_kan_weights(base_weight, poly_weight, gamma, beta,
                                  order=ORDER, matmul_dtype=jnp.float32)
    packed_bf16 = pack_kan_weights(base_weight, poly_weight, gamma, beta,
                                   order=ORDER, matmul_dtype=jnp.bfloat16)

    for poly in ("Chebyshev_1", "Chebyshev_2", "Legendre"):
        ref = kan_layer_reference(x, base_weight, poly_weight, gamma, beta,
                                  polynomial=poly, order=ORDER)

        # f32 path: tight check against the reference.
        out32 = kan_layer_forward_packed(
            x, *packed_f32, polynomial=poly, order=ORDER, out_features=OUT,
            matmul_dtype=jnp.float32, stream_dtype=jnp.float32)
        out32 = jax.block_until_ready(out32)
        assert out32.shape == (B, OUT) and out32.dtype == x.dtype
        assert jnp.allclose(out32, ref, atol=2e-3, rtol=2e-3), \
            f"{poly} f32 mismatch: max abs err {jnp.max(jnp.abs(out32 - ref))}"

        # bf16 path (default, fast; x streamed in bf16): looser sanity check.
        outbf = kan_layer_forward_packed(
            x, *packed_bf16, polynomial=poly, order=ORDER, out_features=OUT,
            matmul_dtype=jnp.bfloat16)
        outbf = jax.block_until_ready(outbf)
        assert jnp.allclose(outbf, ref, atol=1.5e-1, rtol=1.5e-1), \
            f"{poly} bf16 mismatch: max abs err {jnp.max(jnp.abs(outbf - ref))}"

    # Ragged batch (exercises batch padding + output slicing) via the convenience wrapper.
    xr = x[:13]
    ref_r = kan_layer_reference(xr, base_weight, poly_weight, gamma, beta,
                                polynomial="Chebyshev_1", order=ORDER)
    out_r = kan_layer_forward(xr, base_weight, poly_weight, gamma, beta,
                              polynomial="Chebyshev_1", order=ORDER,
                              matmul_dtype=jnp.float32, stream_dtype=jnp.float32)
    out_r = jax.block_until_ready(out_r)
    assert out_r.shape == (13, OUT)
    assert jnp.allclose(out_r, ref_r, atol=2e-3, rtol=2e-3), \
        f"ragged mismatch: max abs err {jnp.max(jnp.abs(out_r - ref_r))}"

    print("KERNEL_OK")
</pallas_src>

<mosaic_0001>
module attributes {stable_mosaic.version = 11 : i64} {
  func.func @_kan_kernel(%arg0: i32, %arg1: memref<2xf32, #tpu.memory_space<smem>>, %arg2: memref<16x32xf32, #tpu.memory_space<vmem>>, %arg3: memref<160x128xf32, #tpu.memory_space<vmem>>, %arg4: memref<1x128xf32, #tpu.memory_space<vmem>>, %arg5: memref<1x128xf32, #tpu.memory_space<vmem>>, %arg6: memref<16x128xf32, #tpu.memory_space<vmem>>, %arg7: memref<16x128xf32, #tpu.memory_space<vmem>>) attributes {dimension_semantics = [#tpu.dimension_semantics<parallel>], iteration_bounds = array<i64: 1>, scalar_prefetch = 0 : i64, scratch_operands = 1 : i64, tpu.core_type = #tpu.core_type<tc>, window_params = [{transform_indices = @transform_0, window_bounds = array<i64: 2>}, {transform_indices = @transform_1, window_bounds = array<i64: 16, 32>}, {pipeline_mode = #tpu.pipeline_mode<synchronous>, transform_indices = @transform_2, window_bounds = array<i64: 160, 128>}, {pipeline_mode = #tpu.pipeline_mode<synchronous>, transform_indices = @transform_3, window_bounds = array<i64: 1, 128>}, {pipeline_mode = #tpu.pipeline_mode<synchronous>, transform_indices = @transform_4, window_bounds = array<i64: 1, 128>}, {transform_indices = @transform_5, window_bounds = array<i64: 16, 128>}]} {
    %c0 = arith.constant 0 : index
    %c0_0 = arith.constant 0 : index
    %0 = vector.load %arg2[%c0, %c0_0] : memref<16x32xf32, #tpu.memory_space<vmem>>, vector<16x32xf32>
    %1 = arith.negf %0 : vector<16x32xf32>
    %2 = math.exp %1 : vector<16x32xf32>
    %cst = arith.constant 1.000000e+00 : f32
    %3 = vector.broadcast %cst : f32 to vector<16x32xf32>
    %4 = arith.addf %3, %2 : vector<16x32xf32>
    %5 = arith.divf %3, %4 : vector<16x32xf32>
    %6 = arith.mulf %0, %5 : vector<16x32xf32>
    %c0_1 = arith.constant 0 : index
    %c0_2 = arith.constant 0 : index
    %7 = vector.load %arg3[%c0_1, %c0_2] : memref<160x128xf32, #tpu.memory_space<vmem>>, vector<32x128xf32>
    %cst_3 = arith.constant dense<0.000000e+00> : vector<16x128xf32>
    %8 = tpu.matmul %6, %7, %cst_3 {dimension_numbers = #tpu.dot_dimension_numbers<[1], [0], [0], [1], [0, 0, 1, 1], [], []>} : vector<16x32xf32>, vector<32x128xf32>, vector<16x128xf32> -> vector<16x128xf32>
    %c0_4 = arith.constant 0 : index
    %c0_5 = arith.constant 0 : index
    %9 = vector.load %arg7[%c0_4, %c0_5] : memref<16x128xf32, #tpu.memory_space<vmem>>, vector<16x128xf32>
    tpu.vector_store %arg7[%c0_4, %c0_5], %8 {strides = array<i32>} : memref<16x128xf32, #tpu.memory_space<vmem>>, vector<16x128xf32>,
    %c0_6 = arith.constant 0 : index
    %10 = memref.load %arg1[%c0_6] : memref<2xf32, #tpu.memory_space<smem>>
    %11 = vector.broadcast %10 : f32 to vector<16x32xf32>
    %12 = arith.mulf %0, %11 : vector<16x32xf32>
    %c1 = arith.constant 1 : index
    %13 = memref.load %arg1[%c1] : memref<2xf32, #tpu.memory_space<smem>>
    %14 = vector.broadcast %13 : f32 to vector<16x32xf32>
    %15 = arith.addf %12, %14 : vector<16x32xf32>
    %cst_7 = arith.constant 1.000000e+00 : f32
    %16 = vector.broadcast %cst_7 : f32 to vector<16x32xf32>
    %c0_8 = arith.constant 0 : index
    %c0_9 = arith.constant 0 : index
    %17 = vector.load %arg7[%c0_8, %c0_9] : memref<16x128xf32, #tpu.memory_space<vmem>>, vector<16x128xf32>
    %c32 = arith.constant 32 : index
    %c0_10 = arith.constant 0 : index
    %18 = vector.load %arg3[%c32, %c0_10] : memref<160x128xf32, #tpu.memory_space<vmem>>, vector<32x128xf32>
    %cst_11 = arith.constant dense<0.000000e+00> : vector<16x128xf32>
    %19 = tpu.matmul %16, %18, %cst_11 {dimension_numbers = #tpu.dot_dimension_numbers<[1], [0], [0], [1], [0, 0, 1, 1], [], []>} : vector<16x32xf32>, vector<32x128xf32>, vector<16x128xf32> -> vector<16x128xf32>
    %20 = arith.addf %17, %19 : vector<16x128xf32>
    %c0_12 = arith.constant 0 : index
    %c0_13 = arith.constant 0 : index
    %21 = vector.load %arg7[%c0_12, %c0_13] : memref<16x128xf32, #tpu.memory_space<vmem>>, vector<16x128xf32>
    tpu.vector_store %arg7[%c0_12, %c0_13], %20 {strides = array<i32>} : memref<16x128xf32, #tpu.memory_space<vmem>>, vector<16x128xf32>,
    %c0_14 = arith.constant 0 : index
    %c0_15 = arith.constant 0 : index
    %22 = vector.load %arg7[%c0_14, %c0_15] : memref<16x128xf32, #tpu.memory_space<vmem>>, vector<16x128xf32>
    %c64 = arith.constant 64 : index
    %c0_16 = arith.constant 0 : index
    %23 = vector.load %arg3[%c64, %c0_16] : memref<160x128xf32, #tpu.memory_space<vmem>>, vector<32x128xf32>
    %cst_17 = arith.constant dense<0.000000e+00> : vector<16x128xf32>
    %24 = tpu.matmul %15, %23, %cst_17 {dimension_numbers = #tpu.dot_dimension_numbers<[1], [0], [0], [1], [0, 0, 1, 1], [], []>} : vector<16x32xf32>, vector<32x128xf32>, vector<16x128xf32> -> vector<16x128xf32>
    %25 = arith.addf %22, %24 : vector<16x128xf32>
    %c0_18 = arith.constant 0 : index
    %c0_19 = arith.constant 0 : index
    %26 = vector.load %arg7[%c0_18, %c0_19] : memref<16x128xf32, #tpu.memory_space<vmem>>, vector<16x128xf32>
    tpu.vector_store %arg7[%c0_18, %c0_19], %25 {strides = array<i32>} : memref<16x128xf32, #tpu.memory_space<vmem>>, vector<16x128xf32>,
    %cst_20 = arith.constant 2.000000e+00 : f32
    %27 = vector.broadcast %cst_20 : f32 to vector<16x32xf32>
    %28 = arith.mulf %27, %15 : vector<16x32xf32>
    %29 = arith.mulf %28, %15 : vector<16x32xf32>
    %30 = arith.subf %29, %16 : vector<16x32xf32>
    %c0_21 = arith.constant 0 : index
    %c0_22 = arith.constant 0 : index
    %31 = vector.load %arg7[%c0_21, %c0_22] : memref<16x128xf32, #tpu.memory_space<vmem>>, vector<16x128xf32>
    %c96 = arith.constant 96 : index
    %c0_23 = arith.constant 0 : index
    %32 = vector.load %arg3[%c96, %c0_23] : memref<160x128xf32, #tpu.memory_space<vmem>>, vector<32x128xf32>
    %cst_24 = arith.constant dense<0.000000e+00> : vector<16x128xf32>
    %33 = tpu.matmul %30, %32, %cst_24 {dimension_numbers = #tpu.dot_dimension_numbers<[1], [0], [0], [1], [0, 0, 1, 1], [], []>} : vector<16x32xf32>, vector<32x128xf32>, vector<16x128xf32> -> vector<16x128xf32>
    %34 = arith.addf %31, %33 : vector<16x128xf32>
    %c0_25 = arith.constant 0 : index
    %c0_26 = arith.constant 0 : index
    %35 = vector.load %arg7[%c0_25, %c0_26] : memref<16x128xf32, #tpu.memory_space<vmem>>, vector<16x128xf32>
    tpu.vector_store %arg7[%c0_25, %c0_26], %34 {strides = array<i32>} : memref<16x128xf32, #tpu.memory_space<vmem>>, vector<16x128xf32>,
    %cst_27 = arith.constant 2.000000e+00 : f32
    %36 = vector.broadcast %cst_27 : f32 to vector<16x32xf32>
    %37 = arith.mulf %36, %15 : vector<16x32xf32>
    %38 = arith.mulf %37, %30 : vector<16x32xf32>
    %39 = arith.subf %38, %15 : vector<16x32xf32>
    %c0_28 = arith.constant 0 : index
    %c0_29 = arith.constant 0 : index
    %40 = vector.load %arg7[%c0_28, %c0_29] : memref<16x128xf32, #tpu.memory_space<vmem>>, vector<16x128xf32>
    %c128 = arith.constant 128 : index
    %c0_30 = arith.constant 0 : index
    %41 = vector.load %arg3[%c128, %c0_30] : memref<160x128xf32, #tpu.memory_space<vmem>>, vector<32x128xf32>
    %cst_31 = arith.constant dense<0.000000e+00> : vector<16x128xf32>
    %42 = tpu.matmul %39, %41, %cst_31 {dimension_numbers = #tpu.dot_dimension_numbers<[1], [0], [0], [1], [0, 0, 1, 1], [], []>} : vector<16x32xf32>, vector<32x128xf32>, vector<16x128xf32> -> vector<16x128xf32>
    %43 = arith.addf %40, %42 : vector<16x128xf32>
    %c0_32 = arith.constant 0 : index
    %c0_33 = arith.constant 0 : index
    %44 = vector.load %arg7[%c0_32, %c0_33] : memref<16x128xf32, #tpu.memory_space<vmem>>, vector<16x128xf32>
    tpu.vector_store %arg7[%c0_32, %c0_33], %43 {strides = array<i32>} : memref<16x128xf32, #tpu.memory_space<vmem>>, vector<16x128xf32>,
    %c0_34 = arith.constant 0 : index
    %c0_35 = arith.constant 0 : index
    %45 = vector.load %arg7[%c0_34, %c0_35] : memref<16x128xf32, #tpu.memory_space<vmem>>, vector<16x128xf32>
    %cst_36 = arith.constant dense<0.000000e+00> : vector<16xf32>
    %46 = vector.multi_reduction <add>, %45, %cst_36 [1] : vector<16x128xf32> to vector<16xf32>
    %47 = vector.shape_cast %46 : vector<16xf32> to vector<16x1xf32>
    %cst_37 = arith.constant 3.125000e-02 : f32
    %48 = vector.broadcast %cst_37 : f32 to vector<16x1xf32>
    %49 = arith.mulf %47, %48 : vector<16x1xf32>
    %50 = vector.broadcast %49 : vector<16x1xf32> to vector<16x128xf32>
    %51 = arith.subf %45, %50 : vector<16x128xf32>
    %52 = arith.mulf %51, %51 : vector<16x128xf32>
    %cst_38 = arith.constant dense<0.000000e+00> : vector<16xf32>
    %53 = vector.multi_reduction <add>, %52, %cst_38 [1] : vector<16x128xf32> to vector<16xf32>
    %54 = vector.shape_cast %53 : vector<16xf32> to vector<16x1xf32>
    %cst_39 = arith.constant 9.600000e+01 : f32
    %55 = vector.broadcast %cst_39 : f32 to vector<16x1xf32>
    %56 = arith.mulf %55, %49 : vector<16x1xf32>
    %57 = arith.mulf %56, %49 : vector<16x1xf32>
    %58 = arith.subf %54, %57 : vector<16x1xf32>
    %cst_40 = arith.constant 3.125000e-02 : f32
    %59 = vector.broadcast %cst_40 : f32 to vector<16x1xf32>
    %60 = arith.mulf %58, %59 : vector<16x1xf32>
    %cst_41 = arith.constant 9.99999974E-6 : f32
    %61 = vector.broadcast %cst_41 : f32 to vector<16x1xf32>
    %62 = arith.addf %60, %61 : vector<16x1xf32>
    %63 = math.rsqrt %62 : vector<16x1xf32>
    %64 = vector.broadcast %63 : vector<16x1xf32> to vector<16x128xf32>
    %65 = arith.mulf %51, %64 : vector<16x128xf32>
    %c0_42 = arith.constant 0 : index
    %c0_43 = arith.constant 0 : index
    %66 = vector.load %arg4[%c0_42, %c0_43] : memref<1x128xf32, #tpu.memory_space<vmem>>, vector<1x128xf32>
    %67 = vector.broadcast %66 : vector<1x128xf32> to vector<16x128xf32>
    %68 = arith.mulf %65, %67 : vector<16x128xf32>
    %c0_44 = arith.constant 0 : index
    %c0_45 = arith.constant 0 : index
    %69 = vector.load %arg5[%c0_44, %c0_45] : memref<1x128xf32, #tpu.memory_space<vmem>>, vector<1x128xf32>
    %70 = vector.broadcast %69 : vector<1x128xf32> to vector<16x128xf32>
    %71 = arith.addf %68, %70 : vector<16x128xf32>
    %72 = arith.negf %71 : vector<16x128xf32>
    %73 = math.exp %72 : vector<16x128xf32>
    %cst_46 = arith.constant 1.000000e+00 : f32
    %74 = vector.broadcast %cst_46 : f32 to vector<16x128xf32>
    %75 = arith.addf %74, %73 : vector<16x128xf32>
    %76 = arith.divf %74, %75 : vector<16x128xf32>
    %77 = arith.mulf %71, %76 : vector<16x128xf32>
    %c0_47 = arith.constant 0 : index
    %c0_48 = arith.constant 0 : index
    %78 = vector.load %arg6[%c0_47, %c0_48] : memref<16x128xf32, #tpu.memory_space<vmem>>, vector<16x128xf32>
    tpu.vector_store %arg6[%c0_47, %c0_48], %77 {strides = array<i32>} : memref<16x128xf32, #tpu.memory_space<vmem>>, vector<16x128xf32>,
    return
  }
  func.func @transform_0(%arg0: i32) -> i32 {
    %c0_i32 = arith.constant 0 : i32
    %c0_i32_0 = arith.constant 0 : i32
    return %c0_i32 : i32
  }
  func.func @transform_1(%arg0: i32) -> (i32, i32) {
    %c0_i32 = arith.constant 0 : i32
    %c0_i32_0 = arith.constant 0 : i32
    return %arg0, %c0_i32 : i32, i32
  }
  func.func @transform_2(%arg0: i32) -> (i32, i32) {
    %c0_i32 = arith.constant 0 : i32
    %c0_i32_0 = arith.constant 0 : i32
    %c0_i32_1 = arith.constant 0 : i32
    return %c0_i32, %c0_i32_0 : i32, i32
  }
  func.func @transform_3(%arg0: i32) -> (i32, i32) {
    %c0_i32 = arith.constant 0 : i32
    %c0_i32_0 = arith.constant 0 : i32
    %c0_i32_1 = arith.constant 0 : i32
    return %c0_i32, %c0_i32_0 : i32, i32
  }
  func.func @transform_4(%arg0: i32) -> (i32, i32) {
    %c0_i32 = arith.constant 0 : i32
    %c0_i32_0 = arith.constant 0 : i32
    %c0_i32_1 = arith.constant 0 : i32
    return %c0_i32, %c0_i32_0 : i32, i32
  }
  func.func @transform_5(%arg0: i32) -> (i32, i32) {
    %c0_i32 = arith.constant 0 : i32
    %c0_i32_0 = arith.constant 0 : i32
    return %arg0, %c0_i32 : i32, i32
  }
}

</mosaic_0001>

<bundles_post_ra>
// kernel: tpu_custom_call.1
= control target key start
LH: loop header
LB: loop body
LE: loop exit
PB: predicated region body
PF: predicated region fallthrough
CT: control target
= control target key end

     0   :  { %10 = vsyncpa [#allocation6], 0  ;;  %s682_s0 = inlined_call_operand.hbm [shape: f32[2], index: 0, kind: input, shape index: {}]   ;;  %s683_s1 = inlined_call_operand.hbm [shape: f32[16,32], index: 1, kind: input, shape index: {}]   ;;  %s684_s2 = inlined_call_operand.hbm [shape: f32[160,128], index: 2, kind: input, shape index: {}]   ;;  %s685_s3 = inlined_call_operand.vmem [shape: f32[1,128], index: 3, kind: input, shape index: {}]   ;;  %s686_s4 = inlined_call_operand.vmem [shape: f32[1,128], index: 4, kind: input, shape index: {}]   ;;  %s687_s5 = inlined_call_operand.hbm [shape: f32[16,128], index: 5, kind: output, shape index: {}]  }
   0x1   :  { %11 = vsyncpa [#allocation4], 0 }
   0x2   :  { %12 = vsyncpa [#allocation9], 0 }
   0x3   :  { %13 = vsyncpa [#allocation5], 0  ;;  %s19_s20 = sshll.u32 %s682_s0, 4  ;;  %s27_s23 = sshll.u32 %s683_s1, 4  ;;  %s20_s20 = int_to_ptr.hbm [resolvable:$true] %s19_s20  ;;  %s28_s23 = int_to_ptr.hbm [resolvable:$true] %s27_s23 }
   0x4   :  { %s580_s24 = smov [#allocation3]   ;;  %s581_s25 = smov [#allocation7]  }
   0x5   :  { %22 = dma.hbm_to_smem %s20_s20, 16, %s580_s24, [#allocation6]  }
   0x6   :  { %s29_s26 = sshll.u32 %s581_s25, 4  ;;  %s582_s27 = smov 128   ;;  %s30_s26 = int_to_ptr.vmem [resolvable:$true] %s29_s26 }
   0x7   :  { %s583_s28 = smov 8   ;;  %s40_s0 = sshll.u32 %s684_s2, 4  ;;  %s41_s0 = int_to_ptr.hbm [resolvable:$true] %s40_s0 }
   0x8   :  { %35 = dma.hbm_to_vmem [thread:$0]  %s28_s23, 256, %s30_s26, [#allocation4], %s582_s27, %s582_s27, %s583_s28  }
   0x9   :  { %s584_s6 = smov [#allocation8]  }
   0xa   :  { %s42_s7 = sshll.u32 %s584_s6, 4  ;;  %s43_s7 = int_to_ptr.vmem [resolvable:$true] %s42_s7 }
   0xb   :  { %48 = dma.hbm_to_vmem [thread:$0]  %s41_s0, 2560, %s43_s7, [#allocation9], %s582_s27, %s582_s27, %s583_s28  }
   0xc   :  { %572 = dma.done.wait [#allocation6], 16  }
   0xd   :  { %573 = vsyncadd [#allocation6], 4294967280 }
   0xe   :  { %574 = dma.done.wait [#allocation4], 256  }
   0xf   :  { %575 = vsyncadd [#allocation4], 4294967040 }
  0x10   :  { %576 = dma.done.wait [#allocation9], 2560  }
  0x11   :  { %577 = vsyncadd [#allocation9], 4294964736 }
  0x12   :  { %65 = sfence }
  0x13   :  { %v111_v0 = vld [vmem:[#allocation8 + $0x18] sm:$0xff]  ;;  %v110_v1 = vld [vmem:[#allocation8 + $0x10] sm:$0xff]  ;;  %s632_s1 = sld [smem:[#allocation3]]  ;;  %v109_v4 = vld [vmem:[#allocation8 + $0x8] sm:$0xff]  ;;  %vm112_vm0 = vcmask 261120   ;;  %s423_s14 = sshll.u32 %s687_s5, 4  ;;  %s424_s14 = int_to_ptr.hbm [resolvable:$true] %s423_s14 }
  0x14   :  { %455 = vmatpush.msra.mxu1 %v111_v0  ;;  %v193_v2 = vld [vmem:[#allocation8 + $0x58] sm:$0xff]  ;;  %131 = vmatpush.msra.mxu0 %v111_v0  ;;  %v192_v3 = vld [vmem:[#allocation8 + $0x50] sm:$0xff]  ;;  %s634_s2 = sld [smem:[#allocation3 + $0x1]]  ;;  %v191_v8 = vld [vmem:[#allocation8 + $0x48] sm:$0xff]  ;;  %v585_v0 = vmov 1.0  }
  0x15   :  { %212 = vmatpush.msra.mxu2 %v193_v2  ;;  %v238_v5 = vld [vmem:[#allocation8 + $0x78] sm:$0xff]  ;;  %v237_v9 = vld [vmem:[#allocation8 + $0x70] sm:$0xff]  ;;  %v108_v10 = vld [vmem:[#allocation8] sm:$0xff] }
  0x16   :  { %v636_v6 = vld [vmem:[#allocation7 + $0x8] sm:$0xff]  ;;  %456 = vmatpush.msra.mxu1 %v110_v1  ;;  %257 = vmatpush.msra.mxu3 %v238_v5  ;;  %v236_v11 = vld [vmem:[#allocation8 + $0x68] sm:$0xff]  ;;  %v190_v13 = vld [vmem:[#allocation8 + $0x40] sm:$0xff] }
  0x17   :  { %v439_v7 = vmul.f32 -1.442695, %v636_v6  ;;  %213 = vmatpush.msra.mxu2 %v192_v3  ;;  %132 = vmatpush.msra.mxu0 %v110_v1  ;;  %v157_v12 = vld [vmem:[#allocation8 + $0x38] sm:$0xff]  ;;  %v639_v14 = vld [vmem:[#allocation7] sm:$0xff]  ;;  %v235_v17 = vld [vmem:[#allocation8 + $0x60] sm:$0xff] }
  0x18   :  { %457 = vmatpush.msra.mxu1 %v109_v4  ;;  %258 = vmatpush.msra.mxu3 %v237_v9  ;;  %v438_v16 = vmul.f32 -1.442695, %v639_v14  ;;  %v156_v19 = vld [vmem:[#allocation8 + $0x30] sm:$0xff]  ;;  %v281_v22 = vld [vmem:[#allocation8 + $0x98] sm:$0xff]  ;;  %v155_v23 = vld [vmem:[#allocation8 + $0x28] sm:$0xff] }
  0x19   :  { %468 = vpow2.f32 %v439_v7  ;;  %v145_v15 = vstv %s632_s1  ;;  %214 = vmatpush.msra.mxu2 %v191_v8  ;;  %133 = vmatpush.msra.mxu0 %v109_v4  ;;  %v280_v25 = vld [vmem:[#allocation8 + $0x90] sm:$0xff]  ;;  %v154_v28 = vld [vmem:[#allocation8 + $0x20] sm:$0xff]  ;;  %v279_v30 = vld [vmem:[#allocation8 + $0x88] sm:$0xff] }
  0x1a   :  { %458 = vmatpush.msra.mxu1 %v108_v10  ;;  %v147_v18 = vmul.f32 %v145_v15, %v636_v6  ;;  %259 = vmatpush.msra.mxu3 %v236_v11  ;;  %v146_v20 = vmul.f32 %v145_v15, %v639_v14  ;;  %v149_v21 = vstv %s634_s2  ;;  %470 = vpow2.f32 %v438_v16  ;;  %v278_v33 = vld [vmem:[#allocation8 + $0x80] sm:$0xff] }
  0x1b   :  { %215 = vmatpush.msra.mxu2 %v190_v13  ;;  %134 = vmatpush.msra.mxu0 %v108_v10 }
  0x1c   :  { %173 = vmatpush.msrb.mxu1 %v157_v12  ;;  %v646_v24 = vadd.f32 %v149_v21, %v146_v20  ;;  %260 = vmatpush.msra.mxu3 %v235_v17  ;;  %v648_v26 = vadd.f32 %v149_v21, %v147_v18 }
  0x1d   :  { %300 = vmatpush.msrb.mxu0 %v281_v22 }
  0x1e   :  { %174 = vmatpush.msrb.mxu1 %v156_v19  ;;  %445 = vmatmul.msk.f32.vlgmr.msra.gmra.mxu2 %vm112_vm0, %v646_v24  ;;  %v227_v29 = vmul.f32 2.0, %v646_v24  ;;  %v228_v34 = vmul.f32 2.0, %v648_v26 }
  0x1f   :  { %v469_v27 = vpop.eup %468  ;;  %301 = vmatpush.msrb.mxu0 %v280_v25 }
  0x20   :  { %v75_v31 = vadd.f32 1.0, %v469_v27  ;;  %175 = vmatpush.msrb.mxu1 %v155_v23  ;;  %v229_v32 = vmul.f32 %v227_v29, %v646_v24  ;;  %v471_v35 = vpop.eup %470  ;;  %v230_v38 = vmul.f32 %v228_v34, %v648_v26 }
  0x21   :  { %302 = vmatpush.msrb.mxu0 %v279_v30  ;;  %v74_v36 = vadd.f32 1.0, %v471_v35 }
  0x22   :  { %472 = vrcp.f32 %v75_v31  ;;  %176 = vmatpush.msrb.mxu1 %v154_v28  ;;  %v447_v37 = vadd.f32 -1.0, %v229_v32  ;;  %v102_v41 = vand.u32 2147483648, %v75_v31  ;;  %v448_v42 = vadd.f32 -1.0, %v230_v38 }
  0x23   :  { %303 = vmatpush.msrb.mxu0 %v278_v33  ;;  %474 = vrcp.f32 %v74_v36  ;;  %vm96_vm1 = vweird.f32 %v75_v31  ;;  %v100_v45 = vand.u32 2147483647, %v75_v31  ;;  %v87_v49 = vand.u32 2147483648, %v74_v36 }
  0x24   :  { %449 = vmatmul.msk.f32.vlgmr.msra.gmra.mxu3 %vm112_vm0, %v447_v37  ;;  %v103_v48 = vor.u32 1.1754944e-38, %v102_v41  ;;  %vm81_vm4 = vweird.f32 %v74_v36  ;;  %v85_v51 = vand.u32 2147483647, %v74_v36  ;;  %v272_v62 = vmul.f32 %v447_v37, %v227_v29 }
  0x25   :  { %vm101_vm6 = vcmp.eq.f32.partialorder %v100_v45, 8.507059e+37  ;;  %v88_v55 = vor.u32 1.1754944e-38, %v87_v49  ;;  %v273_v1 = vmul.f32 %v448_v42, %v228_v34  ;;  %v466_v49 = vld [vmem:[%s685_s3] ss:$0 sm:$0xff]  ;;  %s586_s3 = smov [#allocation10]  }
  0x26   :  { %446 = vmatmul.msk.f32.gmra.mxu2 %vm112_vm0, %v648_v26  ;;  %vm86_vm8 = vcmp.eq.f32.partialorder %v85_v51, 8.507059e+37  ;;  %v274_v63 = vsub.f32 %v272_v62, %v646_v24 }
  0x27   :  { %v275_v2 = vsub.f32 %v273_v1, %v648_v26 }
  0x28   :  { %v473_v39 = vpop.eup %472 }
  0x29   :  { %v92_v40 = vmul.f32 %v473_v39, %v75_v31  ;;  %v475_v43 = vpop.eup %474  ;;  %vm97_vm2 = vweird.f32 %v473_v39 }
  0x2a   :  { %v77_v46 = vmul.f32 %v475_v43, %v74_v36  ;;  %vm98_vm3 = vmor %vm96_vm1, %vm97_vm2  ;;  %vm82_vm5 = vweird.f32 %v475_v43 }
  0x2b   :  { %v93_v44 = vsub.f32 1.0, %v92_v40  ;;  %vm83_vm7 = vmor %vm81_vm4, %vm82_vm5 }
  0x2c   :  { %450 = vmatmul.msk.f32.gmra.mxu3 %vm112_vm0, %v448_v42  ;;  %v78_v50 = vsub.f32 1.0, %v77_v46 }
  0x2d   :  { %v94_v47 = vmul.f32 %v473_v39, %v93_v44 }
  0x2e   :  { %v79_v53 = vmul.f32 %v475_v43, %v78_v50 }
  0x2f   :  { %v95_v52 = vadd.f32 %v473_v39, %v94_v47 }
  0x30   :  { %v80_v57 = vadd.f32 %v475_v43, %v79_v53  ;;  %v467_v53 = vld [vmem:[%s686_s4] ss:$0 sm:$0xff]  ;;  %s421_s4 = sshll.u32 %s586_s3, 4  ;;  %s422_s4 = int_to_ptr.vmem [resolvable:$true] %s421_s4 }
  0x31   :  { %v99_v54 = vsel %vm98_vm3, %v473_v39, %v95_v52 }
  0x32   :  { %v104_v56 = vsel %vm101_vm6, %v103_v48, %v99_v54  ;;  %v84_v59 = vsel %vm83_vm7, %v475_v43, %v80_v57 }
  0x33   :  { %v107_v58 = vmul.f32 %v104_v56, %v636_v6  ;;  %v89_v60 = vsel %vm86_vm8, %v88_v55, %v84_v59 }
  0x34   :  { %v106_v61 = vmul.f32 %v89_v60, %v639_v14 }
  0x35   :  { %441 = vmatmul.msk.f32.vlgmr.msra.gmra.mxu1 %vm112_vm0, %v107_v58 }
  0x36   :  { %440 = vmatmul.msk.f32.vlgmr.msra.gmra.mxu0 %vm112_vm0, %v106_v61 }
  0x3d   :  { %443 = vmatmul.msk.f32.vlgmr.msrb.gmra.mxu1 %vm112_vm0, %v585_v0 }
  0x3e   :  { %451 = vmatmul.msk.f32.vlgmr.msrb.gmra.mxu0 %vm112_vm0, %v274_v63 }
  0x45   :  { %444 = vmatmul.msk.f32.gmra.mxu1 %vm112_vm0, %v585_v0 }
  0x46   :  { %452 = vmatmul.msk.f32.gmra.mxu0 %vm112_vm0, %v275_v2 }
  0xa1   :  { %v217_v5 = vpop.f32.mrf.mxu2 }
  0xa7   :  { %v262_v7 = vpop.f32.mrf.mxu3 }
  0xa9   :  { %v220_v14 = vpop.f32.mrf.mxu2 }
  0xaf   :  { %v265_v16 = vpop.f32.mrf.mxu3 }
  0xb2   :  { %v139_v3 = vpop.f32.mrf.mxu1 }
  0xb3   :  { %v136_v4 = vpop.f32.mrf.mxu0 }
  0xba   :  { %v178_v6 = vpop.f32.mrf.mxu1 }
  0xbb   :  { %v184_v8 = vadd.f32 %v178_v6, %v136_v4  ;;  %v305_v10 = vpop.f32.mrf.mxu0 }
  0xbd   :  { %v223_v9 = vadd.f32 %v217_v5, %v184_v8 }
  0xbf   :  { %v268_v11 = vadd.f32 %v262_v7, %v223_v9 }
  0xc1   :  { %v311_v12 = vadd.f32 %v305_v10, %v268_v11 }
  0xc2   :  { %v181_v13 = vpop.f32.mrf.mxu1 }
  0xc3   :  { %v185_v15 = vadd.f32 %v181_v13, %v139_v3  ;;  %317 = vadd.xlane.f32.xlu0 %v311_v12  ;;  %v308_v18 = vpop.f32.mrf.mxu0 }
  0xc5   :  { %v224_v17 = vadd.f32 %v220_v14, %v185_v15 }
  0xc7   :  { %v269_v19 = vadd.f32 %v265_v16, %v224_v17 }
  0xc9   :  { %v312_v20 = vadd.f32 %v308_v18, %v269_v19 }
  0xcb   :  { %319 = vadd.xlane.f32.xlu0 %v312_v20 }
 0x136   :  { %v318_v21 = vpop.xlane.xlu0 %317 }
 0x137   :  { %v321_v22 = vmul.f32 0.03125, %v318_v21 }
 0x139   :  { %v323_v23 = vsub.f32 %v311_v12, %v321_v22  ;;  %v331_v29 = vmul.f32 96.0, %v321_v22 }
 0x13b   :  { %v325_v24 = vmul.f32 %v323_v23, %v323_v23  ;;  %v333_v30 = vmul.f32 %v331_v29, %v321_v22 }
 0x13d   :  { %327 = vadd.xlane.f32.xlu1 %v325_v24 }
 0x13e   :  { %v320_v25 = vpop.xlane.xlu0 %319 }
 0x13f   :  { %v322_v26 = vmul.f32 0.03125, %v320_v25 }
 0x141   :  { %v324_v27 = vsub.f32 %v312_v20, %v322_v26  ;;  %v332_v33 = vmul.f32 96.0, %v322_v26 }
 0x143   :  { %v326_v28 = vmul.f32 %v324_v27, %v324_v27  ;;  %v334_v36 = vmul.f32 %v332_v33, %v322_v26 }
 0x145   :  { %329 = vadd.xlane.f32.xlu1 %v326_v28 }
 0x1b0   :  { %v328_v31 = vpop.xlane.xlu1 %327 }
 0x1b1   :  { %v335_v32 = vsub.f32 %v328_v31, %v333_v30 }
 0x1b3   :  { %v337_v34 = vmul.f32 0.03125, %v335_v32 }
 0x1b5   :  { %v339_v35 = vadd.f32 1e-05, %v337_v34 }
 0x1b7   :  { %476 = vrsqrt.f32 %v339_v35  ;;  %vm347_vm10 = vweird.f32 %v339_v35 }
 0x1b8   :  { %v330_v37 = vpop.xlane.xlu1 %329 }
 0x1b9   :  { %v336_v38 = vsub.f32 %v330_v37, %v334_v36 }
 0x1bb   :  { %v338_v39 = vmul.f32 0.03125, %v336_v38 }
 0x1bd   :  { %v477_v40 = vpop.eup %476  ;;  %v340_v41 = vadd.f32 1e-05, %v338_v39 }
 0x1be   :  { %v342_v42 = vmul.f32 %v477_v40, %v339_v35  ;;  %vm348_vm9 = vweird.f32 %v477_v40 }
 0x1bf   :  { %478 = vrsqrt.f32 %v340_v41  ;;  %vm349_vm11 = vmor %vm347_vm10, %vm348_vm9  ;;  %vm357_vm13 = vweird.f32 %v340_v41 }
 0x1c0   :  { %v343_v43 = vmul.f32 %v477_v40, %v342_v42 }
 0x1c2   :  { %v344_v44 = vmul.f32 0.5, %v343_v43 }
 0x1c4   :  { %v345_v45 = vsub.f32 1.5, %v344_v44 }
 0x1c5   :  { %v479_v46 = vpop.eup %478 }
 0x1c6   :  { %v346_v47 = vmul.f32 %v477_v40, %v345_v45  ;;  %v352_v48 = vmul.f32 %v479_v46, %v340_v41  ;;  %vm358_vm12 = vweird.f32 %v479_v46 }
 0x1c7   :  { %vm359_vm14 = vmor %vm357_vm13, %vm358_vm12 }
 0x1c8   :  { %v350_v50 = vsel %vm349_vm11, %v477_v40, %v346_v47  ;;  %v353_v51 = vmul.f32 %v479_v46, %v352_v48 }
 0x1c9   :  { %v361_v52 = vmul.f32 %v350_v50, %v323_v23 }
 0x1ca   :  { %v354_v54 = vmul.f32 0.5, %v353_v51 }
 0x1cb   :  { %v367_v55 = vmul.f32 %v466_v49, %v361_v52 }
 0x1cc   :  { %v355_v56 = vsub.f32 1.5, %v354_v54 }
 0x1cd   :  { %v373_v57 = vadd.f32 %v467_v53, %v367_v55 }
 0x1ce   :  { %v356_v58 = vmul.f32 %v479_v46, %v355_v56 }
 0x1cf   :  { %v453_v59 = vmul.f32 -1.442695, %v373_v57 }
 0x1d0   :  { %v360_v60 = vsel %vm359_vm14, %v479_v46, %v356_v58 }
 0x1d1   :  { %v362_v61 = vmul.f32 %v360_v60, %v324_v27  ;;  %480 = vpow2.f32 %v453_v59 }
 0x1d3   :  { %v368_v62 = vmul.f32 %v466_v49, %v362_v61 }
 0x1d5   :  { %v374_v63 = vadd.f32 %v467_v53, %v368_v62 }
 0x1d7   :  { %v481_v0 = vpop.eup %480  ;;  %v454_v1 = vmul.f32 -1.442695, %v374_v63 }
 0x1d8   :  { %v381_v2 = vadd.f32 1.0, %v481_v0 }
 0x1d9   :  { %482 = vpow2.f32 %v454_v1 }
 0x1da   :  { %484 = vrcp.f32 %v381_v2  ;;  %v394_v8 = vand.u32 2147483648, %v381_v2  ;;  %v392_v10 = vand.u32 2147483647, %v381_v2  ;;  %vm388_vm0 = vweird.f32 %v381_v2 }
 0x1dc   :  { %v395_v13 = vor.u32 1.1754944e-38, %v394_v8  ;;  %vm393_vm2 = vcmp.eq.f32.partialorder %v392_v10, 8.507059e+37 }
 0x1df   :  { %v483_v3 = vpop.eup %482 }
 0x1e0   :  { %v485_v4 = vpop.eup %484  ;;  %v382_v5 = vadd.f32 1.0, %v483_v3 }
 0x1e1   :  { %v384_v6 = vmul.f32 %v485_v4, %v381_v2  ;;  %vm389_vm15 = vweird.f32 %v485_v4 }
 0x1e2   :  { %486 = vrcp.f32 %v382_v5  ;;  %vm390_vm1 = vmor %vm388_vm0, %vm389_vm15  ;;  %v409_v19 = vand.u32 2147483648, %v382_v5  ;;  %v407_v21 = vand.u32 2147483647, %v382_v5  ;;  %vm403_vm4 = vweird.f32 %v382_v5 }
 0x1e3   :  { %v385_v7 = vsub.f32 1.0, %v384_v6 }
 0x1e4   :  { %v410_v23 = vor.u32 1.1754944e-38, %v409_v19  ;;  %vm408_vm6 = vcmp.eq.f32.partialorder %v407_v21, 8.507059e+37 }
 0x1e5   :  { %v386_v9 = vmul.f32 %v485_v4, %v385_v7 }
 0x1e7   :  { %v387_v11 = vadd.f32 %v485_v4, %v386_v9 }
 0x1e8   :  { %v487_v12 = vpop.eup %486 }
 0x1e9   :  { %v391_v14 = vsel %vm390_vm1, %v485_v4, %v387_v11  ;;  %v399_v15 = vmul.f32 %v487_v12, %v382_v5  ;;  %vm404_vm3 = vweird.f32 %v487_v12 }
 0x1ea   :  { %v396_v16 = vsel %vm393_vm2, %v395_v13, %v391_v14  ;;  %vm405_vm5 = vmor %vm403_vm4, %vm404_vm3 }
 0x1eb   :  { %v400_v17 = vsub.f32 1.0, %v399_v15  ;;  %v413_v18 = vmul.f32 %v396_v16, %v373_v57 }
 0x1ed   :  { %v401_v20 = vmul.f32 %v487_v12, %v400_v17  ;;  %415 = vst [vmem:[#allocation10] sm:$0xff] %v413_v18 }
 0x1ef   :  { %v402_v22 = vadd.f32 %v487_v12, %v401_v20 }
 0x1f1   :  { %v406_v24 = vsel %vm405_vm5, %v487_v12, %v402_v22 }
 0x1f2   :  { %v411_v25 = vsel %vm408_vm6, %v410_v23, %v406_v24 }
 0x1f3   :  { %v414_v26 = vmul.f32 %v411_v25, %v374_v63 }
 0x1f5   :  { %416 = vst [vmem:[#allocation10 + $0x8] sm:$0xff] %v414_v26 }
 0x1f6   :  { %429 = dma.vmem_to_hbm [thread:$0]  %s422_s4, 256, %s424_s14, [#allocation5], %s582_s27, %s582_s27, %s583_s28  }
 0x1f7   :  { %578 = dma.done.wait [#allocation5], 256  }
 0x1f8   :  { %579 = vsyncadd [#allocation5], 4294967040 }
 0x1f9   :  { %434 = vsyncpa [#allocation4], 1 }
 0x1fa   :  { %435 = vsyncpa [#allocation9], 1 }
 0x1fb   :  { %436 = vsyncpa [#allocation5], 1 }
 0x1fc   :  { %437 = vsyncpa [#allocation6], 1 }

</bundles_post_ra>
